<compile_context>
chip_gen: v7x
topology: tpu7x:2x2x1
jax: 0.10.0
libtpu: 0.0.40
codegen_flags: <defaults>
</compile_context>

<pallas_src>
import functools
import math

import jax
import jax.numpy as jnp
from jax.experimental import pallas as pl
from jax.experimental.pallas import tpu as pltpu


def _round_up(x, m):
    return (x + m - 1) // m * m


def _device_info():
    """Returns (vmem_limit_bytes, two_tensorcores) with conservative fallbacks."""
    kind = ""
    try:
        kind = jax.devices()[0].device_kind.lower()
    except Exception:
        kind = ""
    two_cores = "v7" in kind
    phys_vmem = None
    try:
        phys_vmem = int(pltpu.get_tpu_info().vmem_capacity_bytes)
    except Exception:
        phys_vmem = None
    if phys_vmem is None:
        phys_vmem = (64 if two_cores else 128) * 1024 * 1024
    # Leave headroom for double-buffers / compiler scratch; cap at 96 MiB.
    vmem_limit = min(int(phys_vmem * 0.7), 96 * 1024 * 1024)
    return vmem_limit, two_cores


# ---------------------------------------------------------------------------
# Fused single-call kernel (whole matrix resident in VMEM): 2x HBM traffic.
# ---------------------------------------------------------------------------
def _grn_fused_kernel(x_ref, gamma_ref, beta_ref, o_ref):
    x = x_ref[...].astype(jnp.float32)                        # (N, D)
    ss = jnp.sum(x * x, axis=0, keepdims=True)                # (1, D)
    gx = jnp.sqrt(ss)
    nx = gx / (jnp.mean(gx, axis=-1, keepdims=True) + 1e-6)
    scale = gamma_ref[...] * nx + 1.0                         # gamma*Nx + 1
    # Re-read x_ref so the full f32 upcast isn't live across both phases (bf16 inputs).
    o_ref[...] = (x_ref[...].astype(jnp.float32) * scale
                  + beta_ref[...]).astype(o_ref.dtype)


# ---------------------------------------------------------------------------
# Pass 1 (tiled path): per-channel sum of squares, (slab, kD) sublane partials
# kept resident as an accumulator over the inner (arbitrary) grid axis.
# Ragged / out-of-range rows are masked via row ids (no wrapper-side padding).
# ---------------------------------------------------------------------------
def _sumsq_kernel(x_ref, ss_ref, *, rows_total, t, gh, slab):
    c = pl.program_id(0)
    i = pl.program_id(1)

    @pl.when(i == 0)
    def _():
        ss_ref[...] = jnp.zeros_like(ss_ref)

    x = x_ref[...].astype(jnp.float32)                        # (t, kD)
    row0 = (c * gh + i) * t
    rid = row0 + jax.lax.broadcasted_iota(jnp.int32, x.shape, 0)
    x2 = jnp.where(rid < rows_total, x * x, 0.0)
    if slab == 8:
        # Free metadata reshape (t, kD) -> (t/8, 8, kD); sum over groups is pure VALU.
        part = jnp.sum(x2.reshape(t // 8, 8, x2.shape[-1]), axis=0)   # (8, kD)
    else:
        part = jnp.sum(x2, axis=0, keepdims=True)                     # (1, kD)
    ss_ref[...] += part[None]


# ---------------------------------------------------------------------------
# Pass 2 (tiled path): pure streaming FMA — out = x * (gamma*Nx + 1) + beta.
# Partial last output block is masked by Pallas (OOB writes dropped).
# ---------------------------------------------------------------------------
def _apply_kernel(x_ref, scale_ref, beta_ref, o_ref):
    x = x_ref[...].astype(jnp.float32)                        # (t, kD)
    o_ref[...] = (x * scale_ref[...] + beta_ref[...]).astype(o_ref.dtype)


def minkowski_grn(feats, gamma, beta, *, row_tile=None, force_two_pass=False):
    """GRN over sparse-tensor features.

    feats: (N, D); gamma, beta: (1, D) parameters. Returns (N, D) in feats.dtype.
    """
    N, D = feats.shape
    gamma32 = gamma.reshape(1, D).astype(jnp.float32)
    beta32 = beta.reshape(1, D).astype(jnp.float32)

    vmem_limit, two_cores = _device_info()
    itemsize = jnp.dtype(feats.dtype).itemsize
    feat_bytes = N * D * itemsize
    f32_bytes = N * D * 4

    # ---------------- fused path: one HBM read + one write of feats ----------------
    # Budget: 2x(in+out) pipeline buffers + ~3 full-size f32 temps.
    fused_budget = int(vmem_limit * 0.8)
    if two_cores:
        fused_budget //= 2   # on v7x, hand larger inputs to the 2-TensorCore path sooner
    fused_est = 4 * feat_bytes + 3 * f32_bytes
    if (not force_two_pass) and fused_est <= fused_budget:
        return pl.pallas_call(
            _grn_fused_kernel,
            out_shape=jax.ShapeDtypeStruct((N, D), feats.dtype),
            grid_spec=pltpu.PrefetchScalarGridSpec(
                num_scalar_prefetch=0,
                grid=(1,),
                in_specs=[
                    pl.BlockSpec((N, D), lambda i: (0, 0)),
                    pl.BlockSpec((1, D), lambda i: (0, 0)),
                    pl.BlockSpec((1, D), lambda i: (0, 0)),
                ],
                out_specs=pl.BlockSpec((N, D), lambda i: (0, 0)),
            ),
            compiler_params=pltpu.CompilerParams(
                dimension_semantics=("arbitrary",),
                vmem_limit_bytes=vmem_limit),
        )(feats, gamma32, beta32)

    # ---------------- two-pass tiled path (no pad / no copy of feats) ----------------
    # Lane-dense packing only when it is a free row-major metadata reshape.
    k = 1
    if D % 128 != 0:
        k_cand = math.lcm(D, 128) // D
        if k_cand > 1 and N % k_cand == 0 and N // k_cand > 0:
            k = k_cand
    kD = k * D
    rows = N // k
    x = feats.reshape(rows, kD) if k > 1 else feats

    sub = {4: 8, 2: 16, 1: 32}.get(itemsize, 8)     # packed sublane multiple for dtype
    row_bytes = kD * itemsize
    block_target = max(row_bytes * sub, min(8 << 20, vmem_limit // 12))
    if row_tile is None:
        t = max(sub, (block_target // row_bytes) // sub * sub)
    else:
        t = max(sub, _round_up(int(row_tile), sub))
    if t >= rows:
        t = rows                                    # single block == full dim (always legal)
        n_blocks = 1
    else:
        n_blocks = -(-rows // t)

    slab = 8 if t % 8 == 0 else 1
    nsplit = 2 if (two_cores and n_blocks >= 2) else 1   # split reduction only on v7x
    gh = -(-n_blocks // nsplit)
    last_blk = n_blocks - 1

    # Pass 1: per-channel sum of squares (resident accumulator over the inner axis).
    # Index map is clamped; logically out-of-range steps are fully masked in-kernel.
    ss_part = pl.pallas_call(
        functools.partial(_sumsq_kernel, rows_total=rows, t=t, gh=gh, slab=slab),
        out_shape=jax.ShapeDtypeStruct((nsplit, slab, kD), jnp.float32),
        grid_spec=pltpu.PrefetchScalarGridSpec(
            num_scalar_prefetch=0,
            grid=(nsplit, gh),
            in_specs=[pl.BlockSpec(
                (t, kD), lambda c, i: (jnp.minimum(c * gh + i, last_blk), 0))],
            out_specs=pl.BlockSpec((1, slab, kD), lambda c, i: (c, 0, 0)),
        ),
        compiler_params=pltpu.CompilerParams(
            dimension_semantics=("parallel", "arbitrary"),
            vmem_limit_bytes=vmem_limit),
    )(x)

    # Tiny (k, D)-sized epilogue outside the kernels: fold split/sublane/lane partials,
    # compute Nx ONCE, pre-fold gamma so pass 2 is a pure FMA.
    ss = ss_part.sum(axis=(0, 1)).reshape(k, D).sum(axis=0, keepdims=True)  # (1, D)
    gx = jnp.sqrt(ss)
    nx = gx / (jnp.mean(gx, axis=-1, keepdims=True) + 1e-6)                 # (1, D)
    scale = gamma32 * nx + 1.0
    if k > 1:
        scale = jnp.tile(scale, (1, k))             # (1, kD)
        beta_t = jnp.tile(beta32, (1, k))           # (1, kD)
    else:
        beta_t = beta32

    # Pass 2: out = x * scale + beta, big streaming tiles, parallel grid.
    out_r = pl.pallas_call(
        _apply_kernel,
        out_shape=jax.ShapeDtypeStruct((rows, kD), feats.dtype),
        grid_spec=pltpu.PrefetchScalarGridSpec(
            num_scalar_prefetch=0,
            grid=(n_blocks,),
            in_specs=[
                pl.BlockSpec((t, kD), lambda i: (i, 0)),
                pl.BlockSpec((1, kD), lambda i: (0, 0)),
                pl.BlockSpec((1, kD), lambda i: (0, 0)),
            ],
            out_specs=pl.BlockSpec((t, kD), lambda i: (i, 0)),
        ),
        compiler_params=pltpu.CompilerParams(
            dimension_semantics=("parallel",),
            vmem_limit_bytes=vmem_limit),
    )(x, scale, beta_t)

    return out_r.reshape(N, D) if k > 1 else out_r


def minkowski_grn_ref(feats, gamma, beta):
    """Pure-JAX reference mirroring the PyTorch forward."""
    gx = jnp.linalg.norm(feats, ord=2, axis=0, keepdims=True)
    nx = gx / (jnp.mean(gx, axis=-1, keepdims=True) + 1e-6)
    return gamma * (feats * nx) + beta + feats


if __name__ == "__main__":
    key = jax.random.PRNGKey(0)
    k1, k2, k3, k4, k5 = jax.random.split(key, 5)
    D = 32

    # Non-zero params to actually exercise the math (module init is zeros).
    gamma = 0.1 * jax.random.normal(k2, (1, D), dtype=jnp.float32)
    beta = 0.1 * jax.random.normal(k3, (1, D), dtype=jnp.float32)

    # Case 1: small input -> fused single-pass kernel.
    N1 = 200
    feats1 = jax.random.normal(k1, (N1, D), dtype=jnp.float32)
    out1 = jax.block_until_ready(minkowski_grn(feats1, gamma, beta))
    ref1 = minkowski_grn_ref(feats1, gamma, beta)
    assert out1.shape == (N1, D) and out1.dtype == jnp.float32
    assert jnp.allclose(out1, ref1, atol=1e-5, rtol=1e-5)

    # Module-default zero-initialized params: forward must be identity on F.
    zg = jnp.zeros((1, D), jnp.float32)
    out1z = jax.block_until_ready(minkowski_grn(feats1, zg, zg))
    assert jnp.allclose(out1z, feats1, atol=1e-5, rtol=1e-5)

    # Case 2: non-tile-aligned N, forced two-pass tiled path
    # (ragged last tile masked in pass 1, OOB output rows dropped in pass 2).
    N2 = 203
    feats2 = jax.random.normal(k4, (N2, D), dtype=jnp.float32)
    out2 = jax.block_until_ready(
        minkowski_grn(feats2, gamma, beta, row_tile=8, force_two_pass=True))
    ref2 = minkowski_grn_ref(feats2, gamma, beta)
    assert out2.shape == (N2, D) and out2.dtype == jnp.float32
    assert jnp.allclose(out2, ref2, atol=1e-5, rtol=1e-5)

    # Case 3: N % k == 0 -> free lane-dense repack ((256, 32) -> (64, 128)), two-pass.
    N3 = 256
    feats3 = jax.random.normal(k5, (N3, D), dtype=jnp.float32)
    out3 = jax.block_until_ready(
        minkowski_grn(feats3, gamma, beta, row_tile=16, force_two_pass=True))
    ref3 = minkowski_grn_ref(feats3, gamma, beta)
    assert out3.shape == (N3, D) and out3.dtype == jnp.float32
    assert jnp.allclose(out3, ref3, atol=1e-5, rtol=1e-5)

    # TODO(synk): SparseTensor coordinate_manager / coordinate_map_key handling is
    # metadata-only bookkeeping and has no Pallas equivalent.
    print("KERNEL_OK")
</pallas_src>

<mosaic_0001>
module attributes {stable_mosaic.version = 11 : i64} {
  func.func @_grn_fused_kernel(%arg0: i32, %arg1: memref<200x32xf32, #tpu.memory_space<vmem>>, %arg2: memref<1x32xf32, #tpu.memory_space<vmem>>, %arg3: memref<1x32xf32, #tpu.memory_space<vmem>>, %arg4: memref<200x32xf32, #tpu.memory_space<vmem>>) attributes {dimension_semantics = [#tpu.dimension_semantics<arbitrary>], iteration_bounds = array<i64: 1>, scalar_prefetch = 0 : i64, scratch_operands = 0 : i64, tpu.core_type = #tpu.core_type<tc>, window_params = [{pipeline_mode = #tpu.pipeline_mode<synchronous>, transform_indices = @transform_0, window_bounds = array<i64: 200, 32>}, {pipeline_mode = #tpu.pipeline_mode<synchronous>, transform_indices = @transform_1, window_bounds = array<i64: 1, 32>}, {pipeline_mode = #tpu.pipeline_mode<synchronous>, transform_indices = @transform_2, window_bounds = array<i64: 1, 32>}, {pipeline_mode = #tpu.pipeline_mode<synchronous>, transform_indices = @transform_3, window_bounds = array<i64: 200, 32>}]} {
    %c0 = arith.constant 0 : index
    %c0_0 = arith.constant 0 : index
    %0 = vector.load %arg1[%c0, %c0_0] : memref<200x32xf32, #tpu.memory_space<vmem>>, vector<200x32xf32>
    %1 = arith.mulf %0, %0 : vector<200x32xf32>
    %cst = arith.constant dense<0.000000e+00> : vector<32xf32>
    %2 = vector.multi_reduction <add>, %1, %cst [0] : vector<200x32xf32> to vector<32xf32>
    %3 = vector.shape_cast %2 : vector<32xf32> to vector<1x32xf32>
    %4 = math.sqrt %3 : vector<1x32xf32>
    %cst_1 = arith.constant dense<0.000000e+00> : vector<1xf32>
    %5 = vector.multi_reduction <add>, %4, %cst_1 [1] : vector<1x32xf32> to vector<1xf32>
    %6 = vector.shape_cast %5 : vector<1xf32> to vector<1x1xf32>
    %cst_2 = arith.constant 3.200000e+01 : f32
    %7 = vector.broadcast %cst_2 : f32 to vector<1x1xf32>
    %8 = arith.divf %6, %7 : vector<1x1xf32>
    %cst_3 = arith.constant 9.99999997E-7 : f32
    %9 = vector.broadcast %cst_3 : f32 to vector<1x1xf32>
    %10 = arith.addf %8, %9 : vector<1x1xf32>
    %11 = vector.broadcast %10 : vector<1x1xf32> to vector<1x32xf32>
    %12 = arith.divf %4, %11 : vector<1x32xf32>
    %c0_4 = arith.constant 0 : index
    %c0_5 = arith.constant 0 : index
    %13 = vector.load %arg2[%c0_4, %c0_5] : memref<1x32xf32, #tpu.memory_space<vmem>>, vector<1x32xf32>
    %14 = arith.mulf %13, %12 : vector<1x32xf32>
    %cst_6 = arith.constant 1.000000e+00 : f32
    %15 = vector.broadcast %cst_6 : f32 to vector<1x32xf32>
    %16 = arith.addf %14, %15 : vector<1x32xf32>
    %c0_7 = arith.constant 0 : index
    %c0_8 = arith.constant 0 : index
    %17 = vector.load %arg1[%c0_7, %c0_8] : memref<200x32xf32, #tpu.memory_space<vmem>>, vector<200x32xf32>
    %18 = vector.broadcast %16 : vector<1x32xf32> to vector<200x32xf32>
    %19 = arith.mulf %17, %18 : vector<200x32xf32>
    %c0_9 = arith.constant 0 : index
    %c0_10 = arith.constant 0 : index
    %20 = vector.load %arg3[%c0_9, %c0_10] : memref<1x32xf32, #tpu.memory_space<vmem>>, vector<1x32xf32>
    %21 = vector.broadcast %20 : vector<1x32xf32> to vector<200x32xf32>
    %22 = arith.addf %19, %21 : vector<200x32xf32>
    %c0_11 = arith.constant 0 : index
    %c0_12 = arith.constant 0 : index
    %23 = vector.load %arg4[%c0_11, %c0_12] : memref<200x32xf32, #tpu.memory_space<vmem>>, vector<200x32xf32>
    tpu.vector_store %arg4[%c0_11, %c0_12], %22 {strides = array<i32>} : memref<200x32xf32, #tpu.memory_space<vmem>>, vector<200x32xf32>,
    return
  }
  func.func @transform_0(%arg0: i32) -> (i32, i32) {
    %c0_i32 = arith.constant 0 : i32
    %c0_i32_0 = arith.constant 0 : i32
    %c0_i32_1 = arith.constant 0 : i32
    return %c0_i32, %c0_i32_0 : i32, i32
  }
  func.func @transform_1(%arg0: i32) -> (i32, i32) {
    %c0_i32 = arith.constant 0 : i32
    %c0_i32_0 = arith.constant 0 : i32
    %c0_i32_1 = arith.constant 0 : i32
    return %c0_i32, %c0_i32_0 : i32, i32
  }
  func.func @transform_2(%arg0: i32) -> (i32, i32) {
    %c0_i32 = arith.constant 0 : i32
    %c0_i32_0 = arith.constant 0 : i32
    %c0_i32_1 = arith.constant 0 : i32
    return %c0_i32, %c0_i32_0 : i32, i32
  }
  func.func @transform_3(%arg0: i32) -> (i32, i32) {
    %c0_i32 = arith.constant 0 : i32
    %c0_i32_0 = arith.constant 0 : i32
    %c0_i32_1 = arith.constant 0 : i32
    return %c0_i32, %c0_i32_0 : i32, i32
  }
}

</mosaic_0001>

<bundles_post_ra>
// kernel: tpu_custom_call.1
= control target key start
LH: loop header
LB: loop body
LE: loop exit
PB: predicated region body
PF: predicated region fallthrough
CT: control target
= control target key end

     0   :  { %8 = vsyncpa [#allocation3], 0  ;;  %s650_s0 = inlined_call_operand.hbm [shape: f32[200,32], index: 0, kind: input, shape index: {}]   ;;  %s651_s1 = inlined_call_operand.hbm [shape: f32[1,32], index: 1, kind: input, shape index: {}]   ;;  %s652_s2 = inlined_call_operand.hbm [shape: f32[1,32], index: 2, kind: input, shape index: {}]   ;;  %s653_s3 = inlined_call_operand.hbm [shape: f32[200,32], index: 3, kind: output, shape index: {}]  }
   0x1   :  { %9 = vsyncpa [#allocation6], 0 }
   0x2   :  { %10 = vsyncpa [#allocation4], 0  ;;  %s387_s12 = smov [#allocation5]   ;;  %s388_s14 = smov [#allocation2]  }
   0x3   :  { %s29_s13 = sshll.u32 %s387_s12, 4  ;;  %s16_s15 = sshll.u32 %s388_s14, 4  ;;  %s30_s13 = int_to_ptr.vmem [resolvable:$true] %s29_s13  ;;  %s413_s15 = int_to_ptr.vmem [resolvable:$true] %s16_s15 }
   0x4   :  { %s293_s18 = scalar_lea.hbm %s651_s1, 16 }
   0x5   :  { %p294_p0 = scmp.ne.s32.totalorder %s651_s1, %s293_s18  ;;  %p297_p1 = scmp.lt.u32.totalorder %s293_s18, %s651_s1 }
   0x7   :  { %p299_p2 = pnand %p297_p1, %p294_p0 }
   0x9   :  { %302 = shalt.err (!%p299_p2)
}
   0xa   :  { %s303_s23 = scalar_lea.vmem %s30_s13, 16  ;;  %s307_s24 = scalar_lea.vmem %s30_s13, 32 }
   0xb   :  { %p304_p3 = scmp.ne.s32.totalorder %s30_s13, %s303_s23  ;;  %p308_p4 = scmp.lt.s32.totalorder %s30_s13, %s30_s13 }
   0xc   :  { %p309_p5 = scmp.lt.s32.totalorder %s307_s24, %s303_s23 }
   0xe   :  { %p310_p6 = por %p309_p5, %p308_p4 }
  0x10   :  { %p311_p7 = pnand %p310_p6, %p304_p3 }
  0x12   :  { %314 = shalt.err (!%p311_p7)
}
  0x13   :  { %32 = dma.hbm_to_vmem [thread:$0]  %s651_s1, 16, %s30_s13, [#allocation6]  }
  0x14   :  { %s315_s29 = scalar_lea.hbm %s650_s0, 3200 }
  0x15   :  { %p316_p8 = scmp.ne.s32.totalorder %s650_s0, %s315_s29  ;;  %p319_p9 = scmp.lt.u32.totalorder %s315_s29, %s650_s0 }
  0x17   :  { %p321_p10 = pnand %p319_p9, %p316_p8 }
  0x19   :  { %324 = shalt.err (!%p321_p10)
}
  0x1a   :  { %s325_s7 = scalar_lea.vmem %s413_s15, 3200  ;;  %p330_p12 = scmp.lt.s32.totalorder %s413_s15, %s413_s15 }
  0x1b   :  { %p326_p11 = scmp.ne.s32.totalorder %s413_s15, %s325_s7  ;;  %p331_p13 = scmp.lt.s32.totalorder %s325_s7, %s325_s7 }
  0x1d   :  { %p332_p0 = por %p331_p13, %p330_p12 }
  0x1f   :  { %p333_p1 = pnand %p332_p0, %p326_p11 }
  0x21   :  { %336 = shalt.err (!%p333_p1)
}
  0x22   :  { %s389_s1 = smov 128   ;;  %s390_s8 = smov 8  }
  0x23   :  { %22 = dma.hbm_to_vmem [thread:$0]  %s650_s0, 3200, %s413_s15, [#allocation3], %s389_s1, %s389_s1, %s390_s8  }
  0x24   :  { %s391_s11 = smov [#allocation7]   ;;  %s337_s16 = scalar_lea.hbm %s652_s2, 16 }
  0x25   :  { %s39_s12 = sshll.u32 %s391_s11, 4  ;;  %p338_p2 = scmp.ne.s32.totalorder %s652_s2, %s337_s16  ;;  %s40_s12 = int_to_ptr.vmem [resolvable:$true] %s39_s12 }
  0x26   :  { %p341_p3 = scmp.lt.u32.totalorder %s337_s16, %s652_s2 }
  0x28   :  { %p343_p4 = pnand %p341_p3, %p338_p2 }
  0x2a   :  { %346 = shalt.err (!%p343_p4)
}
  0x2b   :  { %s347_s21 = scalar_lea.vmem %s40_s12, 16  ;;  %s351_s0 = scalar_lea.vmem %s40_s12, 32 }
  0x2c   :  { %p348_p5 = scmp.ne.s32.totalorder %s40_s12, %s347_s21  ;;  %p352_p6 = scmp.lt.s32.totalorder %s40_s12, %s40_s12 }
  0x2d   :  { %p353_p7 = scmp.lt.s32.totalorder %s351_s0, %s347_s21 }
  0x2f   :  { %p354_p8 = por %p353_p7, %p352_p6 }
  0x31   :  { %p355_p9 = pnand %p354_p8, %p348_p5 }
  0x33   :  { %358 = shalt.err (!%p355_p9)
}
  0x34   :  { %42 = dma.hbm_to_vmem [thread:$0]  %s652_s2, 16, %s40_s12, [#allocation6]  }
  0x35   :  { %381 = dma.done.wait [#allocation3], 3200  }
  0x36   :  { %382 = vsyncadd [#allocation3], 4294964096 }
  0x37   :  { %383 = dma.done.wait [#allocation6], 32  }
  0x38   :  { %384 = vsyncadd [#allocation6], 4294967264  ;;  %v459_v0 = vld [vmem:[#allocation2] sm:$0xff]  ;;  %v461_v1 = vld [vmem:[#allocation2 + $0x8] sm:$0xff]  ;;  %vm102_vm0 = vcmask 261120   ;;  %s392_s2 = smov [#allocation8]  }
  0x39   :  { %v463_v2 = vld [vmem:[#allocation2 + $0x10] sm:$0xff]  ;;  %v465_v3 = vld [vmem:[#allocation2 + $0x18] sm:$0xff]  ;;  %v77_v4 = vmul.f32 %v459_v0, %v459_v0  ;;  %v78_v5 = vmul.f32 %v461_v1, %v461_v1  ;;  %v471_v6 = vld [vmem:[#allocation2 + $0x20] sm:$0xff]  ;;  %s269_s23 = sshll.u32 %s392_s2, 4  ;;  %s270_s23 = int_to_ptr.vmem [resolvable:$true] %s269_s23 }
  0x3a   :  { %v79_v7 = vmul.f32 %v463_v2, %v463_v2  ;;  %v475_v8 = vld [vmem:[#allocation2 + $0x28] sm:$0xff]  ;;  %v80_v10 = vmul.f32 %v465_v3, %v465_v3  ;;  %v481_v12 = vld [vmem:[#allocation2 + $0x30] sm:$0xff]  ;;  %v81_v13 = vmul.f32 %v471_v6, %v471_v6  ;;  %v488_v17 = vld [vmem:[#allocation2 + $0x38] sm:$0xff]  ;;  %s359_s24 = scalar_lea.vmem %s270_s23, 3200  ;;  %p364_p11 = scmp.lt.s32.totalorder %s270_s23, %s270_s23 }
  0x3b   :  { %v103_v9 = vsel %vm102_vm0, %v77_v4, 0.0  ;;  %v104_v11 = vsel %vm102_vm0, %v78_v5, 0.0  ;;  %v82_v15 = vmul.f32 %v475_v8, %v475_v8  ;;  %v83_v19 = vmul.f32 %v481_v12, %v481_v12  ;;  %v493_v21 = vld [vmem:[#allocation2 + $0x40] sm:$0xff]  ;;  %v499_v26 = vld [vmem:[#allocation2 + $0x48] sm:$0xff]  ;;  %v504_v30 = vld [vmem:[#allocation2 + $0x50] sm:$0xff]  ;;  %p360_p10 = scmp.ne.s32.totalorder %s270_s23, %s359_s24  ;;  %p365_p12 = scmp.lt.s32.totalorder %s359_s24, %s359_s24 }
  0x3c   :  { %v105_v14 = vadd.f32 %v104_v11, %v103_v9  ;;  %v106_v16 = vsel %vm102_vm0, %v79_v7, 0.0  ;;  %v108_v20 = vsel %vm102_vm0, %v80_v10, 0.0  ;;  %v110_v23 = vsel %vm102_vm0, %v81_v13, 0.0  ;;  %v509_v34 = vld [vmem:[#allocation2 + $0x58] sm:$0xff]  ;;  %v514_v38 = vld [vmem:[#allocation2 + $0x60] sm:$0xff]  ;;  %v519_v42 = vld [vmem:[#allocation2 + $0x68] sm:$0xff] }
  0x3d   :  { %v84_v24 = vmul.f32 %v488_v17, %v488_v17  ;;  %v112_v25 = vsel %vm102_vm0, %v82_v15, 0.0  ;;  %v85_v28 = vmul.f32 %v493_v21, %v493_v21  ;;  %v114_v29 = vsel %vm102_vm0, %v83_v19, 0.0  ;;  %v524_v46 = vld [vmem:[#allocation2 + $0x70] sm:$0xff]  ;;  %v529_v50 = vld [vmem:[#allocation2 + $0x78] sm:$0xff]  ;;  %v534_v54 = vld [vmem:[#allocation2 + $0x80] sm:$0xff]  ;;  %p366_p13 = por %p365_p12, %p364_p11 }
  0x3e   :  { %v107_v18 = vadd.f32 %v106_v16, %v105_v14  ;;  %v86_v32 = vmul.f32 %v499_v26, %v499_v26  ;;  %v87_v36 = vmul.f32 %v504_v30, %v504_v30  ;;  %v88_v40 = vmul.f32 %v509_v34, %v509_v34  ;;  %v539_v58 = vld [vmem:[#allocation2 + $0x88] sm:$0xff]  ;;  %v544_v62 = vld [vmem:[#allocation2 + $0x90] sm:$0xff]  ;;  %v549_v7 = vld [vmem:[#allocation2 + $0x98] sm:$0xff] }
  0x3f   :  { %v116_v33 = vsel %vm102_vm0, %v84_v24, 0.0  ;;  %v118_v37 = vsel %vm102_vm0, %v85_v28, 0.0  ;;  %v89_v44 = vmul.f32 %v514_v38, %v514_v38  ;;  %v90_v48 = vmul.f32 %v519_v42, %v519_v42  ;;  %v554_v13 = vld [vmem:[#allocation2 + $0xa0] sm:$0xff]  ;;  %v569_v28 = vld [vmem:[#allocation2 + $0xb8] sm:$0xff]  ;;  %p367_p0 = pnand %p366_p13, %p360_p10 }
  0x40   :  { %v109_v22 = vadd.f32 %v108_v20, %v107_v18  ;;  %v120_v41 = vsel %vm102_vm0, %v86_v32, 0.0  ;;  %v122_v45 = vsel %vm102_vm0, %v87_v36, 0.0  ;;  %v124_v49 = vsel %vm102_vm0, %v88_v40, 0.0  ;;  %v559_v18 = vld [vmem:[#allocation2 + $0xa8] sm:$0xff] }
  0x41   :  { %v91_v52 = vmul.f32 %v524_v46, %v524_v46  ;;  %v126_v53 = vsel %vm102_vm0, %v89_v44, 0.0  ;;  %v92_v56 = vmul.f32 %v529_v50, %v529_v50  ;;  %v128_v57 = vsel %vm102_vm0, %v90_v48, 0.0 }
  0x42   :  { %v111_v27 = vadd.f32 %v110_v23, %v109_v22  ;;  %v93_v60 = vmul.f32 %v534_v54, %v534_v54  ;;  %v94_v4 = vmul.f32 %v539_v58, %v539_v58  ;;  %v95_v10 = vmul.f32 %v544_v62, %v544_v62  ;;  %v564_v23 = vld [vmem:[#allocation2 + $0xb0] sm:$0xff] }
  0x43   :  { %v130_v61 = vsel %vm102_vm0, %v91_v52, 0.0  ;;  %v132_v5 = vsel %vm102_vm0, %v92_v56, 0.0  ;;  %v96_v15 = vmul.f32 %v549_v7, %v549_v7  ;;  %v97_v20 = vmul.f32 %v554_v13, %v554_v13 }
  0x44   :  { %v113_v31 = vadd.f32 %v112_v25, %v111_v27  ;;  %v134_v11 = vsel %vm102_vm0, %v93_v60, 0.0  ;;  %v136_v16 = vsel %vm102_vm0, %v94_v4, 0.0  ;;  %v138_v22 = vsel %vm102_vm0, %v95_v10, 0.0 }
  0x45   :  { %v98_v25 = vmul.f32 %v559_v18, %v559_v18  ;;  %v140_v27 = vsel %vm102_vm0, %v96_v15, 0.0  ;;  %v142_v32 = vsel %vm102_vm0, %v97_v20, 0.0  ;;  %v100_v36 = vmul.f32 %v569_v28, %v569_v28 }
  0x46   :  { %v115_v35 = vadd.f32 %v114_v29, %v113_v31  ;;  %v99_v31 = vmul.f32 %v564_v23, %v564_v23 }
  0x47   :  { %v148_v44 = vsel %vm102_vm0, %v100_v36, 0.0 }
  0x48   :  { %v117_v39 = vadd.f32 %v116_v33, %v115_v35  ;;  %v574_v33 = vld [vmem:[#allocation2 + $0xc0] sm:$0xff] }
  0x49   :  { %v101_v40 = vmul.f32 %v574_v33, %v574_v33 }
  0x4a   :  { %v119_v43 = vadd.f32 %v118_v37, %v117_v39  ;;  %v144_v37 = vsel %vm102_vm0, %v98_v25, 0.0 }
  0x4c   :  { %v121_v47 = vadd.f32 %v120_v41, %v119_v43  ;;  %v146_v41 = vsel %vm102_vm0, %v99_v31, 0.0 }
  0x4e   :  { %v123_v51 = vadd.f32 %v122_v45, %v121_v47  ;;  %v150_v47 = vsel %vm102_vm0, %v101_v40, 0.0 }
  0x50   :  { %v125_v55 = vadd.f32 %v124_v49, %v123_v51 }
  0x52   :  { %v127_v59 = vadd.f32 %v126_v53, %v125_v55 }
  0x54   :  { %v129_v63 = vadd.f32 %v128_v57, %v127_v59 }
  0x56   :  { %v131_v9 = vadd.f32 %v130_v61, %v129_v63 }
  0x58   :  { %v133_v14 = vadd.f32 %v132_v5, %v131_v9 }
  0x5a   :  { %v135_v19 = vadd.f32 %v134_v11, %v133_v14  ;;  %v177_v14 = vlaneseq }
  0x5c   :  { %v137_v24 = vadd.f32 %v136_v16, %v135_v19  ;;  %v178_v15 = vshrl.u32 %v177_v14, 7  ;;  %v173_v19 = vld [vmem:[#allocation5] sm:$0x1] }
  0x5e   :  { %v139_v29 = vadd.f32 %v138_v22, %v137_v24  ;;  %v179_v24 = vsub.s32 0, %v178_v15 }
  0x60   :  { %v141_v35 = vadd.f32 %v140_v27, %v139_v29 }
  0x62   :  { %v143_v39 = vadd.f32 %v142_v32, %v141_v35 }
  0x64   :  { %v145_v43 = vadd.f32 %v144_v37, %v143_v39 }
  0x66   :  { %v147_v45 = vadd.f32 %v146_v41, %v145_v43 }
  0x68   :  { %v149_v48 = vadd.f32 %v148_v44, %v147_v45  ;;  %v282_v44 = vld [vmem:[#allocation7] ss:$0 sm:$0xff] }
  0x6a   :  { %v151_v49 = vadd.f32 %v150_v47, %v149_v48 }
  0x6c   :  { %v152_v51 = vrot.slane %v151_v49, 4 }
  0x6e   :  { %v153_v52 = vadd.f32 %v152_v51, %v151_v49 }
  0x70   :  { %v154_v53 = vrot.slane %v153_v52, 2 }
  0x72   :  { %v155_v55 = vadd.f32 %v154_v53, %v153_v52 }
  0x74   :  { %v156_v56 = vrot.slane %v155_v55, 1 }
  0x76   :  { %v157_v57 = vadd.f32 %v156_v56, %v155_v55 }
  0x78   :  { %289 = vrsqrt.f32 %v157_v57  ;;  %vm160_vm1 = vcmp.eq.f32.partialorder %v157_v57, inf  ;;  %v163_v60 = vand.u32 2147483648, %v157_v57  ;;  %vm162_vm2 = vcmp.eq.f32.partialorder %v157_v57, 0.0 }
  0x82   :  { %v290_v59 = vpop.eup %289 }
  0x83   :  { %v159_v61 = vmul.f32 %v290_v59, %v157_v57 }
  0x85   :  { %v161_v63 = vsel %vm160_vm1, %v157_v57, %v159_v61 }
  0x86   :  { %v164_v4 = vsel %vm162_vm2, %v163_v60, %v161_v63 }
  0x87   :  { %v165_v5 = vsel %vm102_vm0, %v164_v4, 0.0 }
  0x88   :  { %166 = vadd.xlane.f32.xlu0 %v165_v5 }
 0x115   :  { %v167_v9 = vpop.xlane.xlu0 %166 }
 0x116   :  { %v169_v10 = vmul.f32 0.03125, %v167_v9 }
 0x118   :  { %v170_v11 = vadd.f32 1e-06, %v169_v10 }
 0x11a   :  { %291 = vrcp.f32 %v170_v11 }
 0x124   :  { %v292_v16 = vpop.eup %291 }
 0x125   :  { %v172_v20 = vmul.f32 %v292_v16, %v164_v4 }
 0x127   :  { %v174_v22 = vmul.f32 %v173_v19, %v172_v20 }
 0x129   :  { %v175_v25 = vadd.f32 1.0, %v174_v22 }
 0x12b   :  { %v180_v27 = vrot.slane %v175_v25, %v179_v24 }
 0x12d   :  { %v182_v29 = vmul.f32 %v180_v27, %v459_v0  ;;  %v183_v31 = vmul.f32 %v180_v27, %v461_v1  ;;  %v184_v32 = vmul.f32 %v180_v27, %v463_v2  ;;  %v185_v35 = vmul.f32 %v180_v27, %v465_v3 }
 0x12e   :  { %v186_v36 = vmul.f32 %v180_v27, %v471_v6  ;;  %v187_v37 = vmul.f32 %v180_v27, %v475_v8  ;;  %v188_v39 = vmul.f32 %v180_v27, %v481_v12  ;;  %v189_v40 = vmul.f32 %v180_v27, %v488_v17 }
 0x12f   :  { %v190_v41 = vmul.f32 %v180_v27, %v493_v21  ;;  %v191_v43 = vmul.f32 %v180_v27, %v499_v26  ;;  %v192_v0 = vmul.f32 %v180_v27, %v504_v30  ;;  %v193_v1 = vmul.f32 %v180_v27, %v509_v34 }
 0x130   :  { %v194_v2 = vmul.f32 %v180_v27, %v514_v38  ;;  %v195_v3 = vmul.f32 %v180_v27, %v519_v42  ;;  %v196_v6 = vmul.f32 %v180_v27, %v524_v46  ;;  %v197_v8 = vmul.f32 %v180_v27, %v529_v50 }
 0x131   :  { %v198_v12 = vmul.f32 %v180_v27, %v534_v54  ;;  %v199_v17 = vmul.f32 %v180_v27, %v539_v58  ;;  %v200_v21 = vmul.f32 %v180_v27, %v544_v62  ;;  %v201_v26 = vmul.f32 %v180_v27, %v549_v7 }
 0x132   :  { %v202_v30 = vmul.f32 %v180_v27, %v554_v13  ;;  %v203_v34 = vmul.f32 %v180_v27, %v559_v18  ;;  %v204_v38 = vmul.f32 %v180_v27, %v564_v23  ;;  %v205_v42 = vmul.f32 %v180_v27, %v569_v28 }
 0x133   :  { %v206_v46 = vmul.f32 %v180_v27, %v574_v33  ;;  %v214_v50 = vadd.f32 %v282_v44, %v182_v29  ;;  %v215_v45 = vadd.f32 %v282_v44, %v183_v31  ;;  %v216_v47 = vadd.f32 %v282_v44, %v184_v32 }
 0x134   :  { %v217_v54 = vadd.f32 %v282_v44, %v185_v35  ;;  %v218_v48 = vadd.f32 %v282_v44, %v186_v36  ;;  %v219_v58 = vadd.f32 %v282_v44, %v187_v37  ;;  %v220_v49 = vadd.f32 %v282_v44, %v188_v39 }
 0x135   :  { %v221_v62 = vadd.f32 %v282_v44, %v189_v40  ;;  %v222_v51 = vadd.f32 %v282_v44, %v190_v41  ;;  %v223_v7 = vadd.f32 %v282_v44, %v191_v43  ;;  %v224_v52 = vadd.f32 %v282_v44, %v192_v0  ;;  %239 = vst.msk [vmem:[#allocation8] sm:$0xff] %vm102_vm0, %v214_v50 }
 0x136   :  { %240 = vst.msk [vmem:[#allocation8 + $0x8] sm:$0xff] %vm102_vm0, %v215_v45  ;;  %241 = vst.msk [vmem:[#allocation8 + $0x10] sm:$0xff] %vm102_vm0, %v216_v47  ;;  %v225_v13 = vadd.f32 %v282_v44, %v193_v1  ;;  %v226_v18 = vadd.f32 %v282_v44, %v194_v2  ;;  %v227_v23 = vadd.f32 %v282_v44, %v195_v3 }
 0x137   :  { %v228_v28 = vadd.f32 %v282_v44, %v196_v6  ;;  %242 = vst.msk [vmem:[#allocation8 + $0x18] sm:$0xff] %vm102_vm0, %v217_v54  ;;  %243 = vst.msk [vmem:[#allocation8 + $0x20] sm:$0xff] %vm102_vm0, %v218_v48  ;;  %v229_v33 = vadd.f32 %v282_v44, %v197_v8  ;;  %v230_v53 = vadd.f32 %v282_v44, %v198_v12 }
 0x138   :  { %244 = vst.msk [vmem:[#allocation8 + $0x28] sm:$0xff] %vm102_vm0, %v219_v58  ;;  %245 = vst.msk [vmem:[#allocation8 + $0x30] sm:$0xff] %vm102_vm0, %v220_v49  ;;  %v231_v55 = vadd.f32 %v282_v44, %v199_v17  ;;  %v232_v56 = vadd.f32 %v282_v44, %v200_v21  ;;  %v233_v57 = vadd.f32 %v282_v44, %v201_v26 }
 0x139   :  { %246 = vst.msk [vmem:[#allocation8 + $0x38] sm:$0xff] %vm102_vm0, %v221_v62  ;;  %247 = vst.msk [vmem:[#allocation8 + $0x40] sm:$0xff] %vm102_vm0, %v222_v51  ;;  %v234_v59 = vadd.f32 %v282_v44, %v202_v30  ;;  %v235_v60 = vadd.f32 %v282_v44, %v203_v34  ;;  %v236_v61 = vadd.f32 %v282_v44, %v204_v38 }
 0x13a   :  { %248 = vst.msk [vmem:[#allocation8 + $0x48] sm:$0xff] %vm102_vm0, %v223_v7  ;;  %249 = vst.msk [vmem:[#allocation8 + $0x50] sm:$0xff] %vm102_vm0, %v224_v52  ;;  %v237_v63 = vadd.f32 %v282_v44, %v205_v42  ;;  %v238_v4 = vadd.f32 %v282_v44, %v206_v46 }
 0x13b   :  { %250 = vst.msk [vmem:[#allocation8 + $0x58] sm:$0xff] %vm102_vm0, %v225_v13  ;;  %251 = vst.msk [vmem:[#allocation8 + $0x60] sm:$0xff] %vm102_vm0, %v226_v18 }
 0x13c   :  { %252 = vst.msk [vmem:[#allocation8 + $0x68] sm:$0xff] %vm102_vm0, %v227_v23  ;;  %253 = vst.msk [vmem:[#allocation8 + $0x70] sm:$0xff] %vm102_vm0, %v228_v28 }
 0x13d   :  { %254 = vst.msk [vmem:[#allocation8 + $0x78] sm:$0xff] %vm102_vm0, %v229_v33  ;;  %255 = vst.msk [vmem:[#allocation8 + $0x80] sm:$0xff] %vm102_vm0, %v230_v53 }
 0x13e   :  { %256 = vst.msk [vmem:[#allocation8 + $0x88] sm:$0xff] %vm102_vm0, %v231_v55  ;;  %257 = vst.msk [vmem:[#allocation8 + $0x90] sm:$0xff] %vm102_vm0, %v232_v56 }
 0x13f   :  { %258 = vst.msk [vmem:[#allocation8 + $0x98] sm:$0xff] %vm102_vm0, %v233_v57  ;;  %259 = vst.msk [vmem:[#allocation8 + $0xa0] sm:$0xff] %vm102_vm0, %v234_v59 }
 0x140   :  { %260 = vst.msk [vmem:[#allocation8 + $0xa8] sm:$0xff] %vm102_vm0, %v235_v60  ;;  %261 = vst.msk [vmem:[#allocation8 + $0xb0] sm:$0xff] %vm102_vm0, %v236_v61 }
 0x141   :  { %262 = vst.msk [vmem:[#allocation8 + $0xb8] sm:$0xff] %vm102_vm0, %v237_v63  ;;  %263 = vst.msk [vmem:[#allocation8 + $0xc0] sm:$0xff] %vm102_vm0, %v238_v4 }
 0x142   :  { %370 = shalt.err (!%p367_p0)
}
 0x143   :  { %s371_s27 = scalar_lea.hbm %s653_s3, 3200 }
 0x144   :  { %p372_p1 = scmp.ne.s32.totalorder %s653_s3, %s371_s27  ;;  %p375_p2 = scmp.lt.u32.totalorder %s371_s27, %s653_s3 }
 0x146   :  { %p377_p3 = pnand %p375_p2, %p372_p1 }
 0x148   :  { %380 = shalt.err (!%p377_p3)
}
 0x149   :  { %275 = dma.vmem_to_hbm [thread:$0]  %s270_s23, 3200, %s653_s3, [#allocation4], %s389_s1, %s389_s1, %s390_s8  }
 0x14a   :  { %385 = dma.done.wait [#allocation4], 3200  }
 0x14b   :  { %386 = vsyncadd [#allocation4], 4294964096 }
 0x14c   :  { %279 = vsyncpa [#allocation3], 1 }
 0x14d   :  { %280 = vsyncpa [#allocation6], 1 }
 0x14e   :  { %281 = vsyncpa [#allocation4], 1 }

</bundles_post_ra>
